<compile_context>
chip_gen: v7x
topology: tpu7x:2x2x1
jax: 0.10.0
libtpu: 0.0.40
codegen_flags: <defaults>
</compile_context>

<pallas_src>
import jax
import jax.numpy as jnp
from jax.experimental import pallas as pl
from jax.experimental.pallas import tpu as pltpu


# ----------------------------------------------------------------------------
# Fused GCB kernel (Bt images per grid step)
# ----------------------------------------------------------------------------
def _gcb_kernel(x_ref, wpack_ref, bpack_ref, o_ref):
    """x_ref: (Bt, C, HW) native dtype.  wpack: (C, 2Cr+2).  bpack: (1, 1+Cr)."""
    Cr = bpack_ref.shape[1] - 1

    x = x_ref[...].astype(jnp.float32)                              # (Bt, C, HW)

    # unpack resident weight slab (static slices, once per grid step)
    w1  = wpack_ref[:, 0:1]                                         # (C, 1)
    w2t = wpack_ref[:, 1:1 + Cr]                                    # (C, Cr)
    w3  = wpack_ref[:, 1 + Cr:1 + 2 * Cr]                           # (C, Cr)
    b3  = wpack_ref[:, 1 + 2 * Cr:2 + 2 * Cr]                       # (C, 1)
    b1  = bpack_ref[:, 0:1]                                         # (1, 1)
    b2  = bpack_ref[:, 1:1 + Cr]                                    # (1, Cr)

    # conv1: 1x1 conv C -> 1  == per-pixel dot(x[:, :, p], w1)  (VPU + sublane reduce)
    logits = jnp.sum(x * w1[None], axis=1, keepdims=True) + b1      # (Bt, 1, HW)

    # softmax over the spatial (lane) axis, normalization deferred
    z = jnp.exp(logits - jnp.max(logits, axis=-1, keepdims=True))   # (Bt, 1, HW)
    denom = jnp.sum(z, axis=-1, keepdims=True)                      # (Bt, 1, 1)

    # global context: attention-weighted pooling, normalize the pooled result
    ctx = jnp.sum(x * z, axis=-1, keepdims=True) / denom            # (Bt, C, 1)

    # channel-attention MLP: conv1x1 (C->Cr) -> ReLU -> conv1x1 (Cr->C)
    hid = jnp.sum(w2t[None] * ctx, axis=1, keepdims=True) + b2      # (Bt, 1, Cr)
    hid = jnp.maximum(hid, 0.0)
    ca = jnp.sum(w3[None] * hid, axis=-1, keepdims=True) + b3[None] # (Bt, C, 1)

    # rescale input; lane-dense store (last dim = HW, multiple of 128)
    o_ref[...] = (x * ca).astype(o_ref.dtype)


def _pick_batch_tile(B, per_image_bytes, target_bytes=1 << 20):
    """Pick images-per-block so a block is ~1 MiB, but keep >=2 grid steps."""
    bt = max(1, target_bytes // max(per_image_bytes, 1))
    if B >= 2:
        bt = min(bt, pl.cdiv(B, 2))   # keep grid length >= 2 for v7x megacore
    return int(min(bt, B))


# ----------------------------------------------------------------------------
# Wrapper (single jitted call; glue reshapes/pads fuse under jit)
# ----------------------------------------------------------------------------
@jax.jit
def gcb_forward(x, params):
    """GCB forward.  x: (B, C, H, W) NCHW (PyTorch layout).  Returns (B, C, H, W)."""
    B, C, H, W = x.shape
    HW = H * W
    itemsize = jnp.dtype(x.dtype).itemsize

    w1 = params["conv1_w"].reshape(1, C).astype(jnp.float32)        # (1, C)
    b1 = params["conv1_b"].reshape(1).astype(jnp.float32)           # (1,)
    w2 = params["ca0_w"].reshape(-1, C).astype(jnp.float32)         # (Cr, C)
    Cr = w2.shape[0]
    b2 = params["ca0_b"].reshape(Cr).astype(jnp.float32)            # (Cr,)
    w3 = params["ca2_w"].reshape(C, Cr).astype(jnp.float32)         # (C, Cr)
    b3 = params["ca2_b"].reshape(C).astype(jnp.float32)             # (C,)

    # pack the six tiny parameter arrays into two resident VMEM blocks
    wpack = jnp.concatenate([w1.T, w2.T, w3, b3[:, None]], axis=1)  # (C, 2Cr+2)
    bpack = jnp.concatenate([b1, b2])[None, :]                      # (1, 1+Cr)

    # keep x in its native dtype (no f32 staging copy in HBM)
    xf = x.reshape(B, C, HW)

    Bt = _pick_batch_tile(B, C * HW * itemsize)
    nb = pl.cdiv(B, Bt)
    Bp = nb * Bt
    if Bp != B:
        xf = jnp.pad(xf, ((0, Bp - B), (0, 0), (0, 0)))

    block_bytes = Bt * C * HW * itemsize
    # in + out, double-buffered, plus headroom; clamped to fit every generation
    vmem_limit = int(min(max(4 * block_bytes + (8 << 20), 32 << 20), 60 << 20))

    cost = pl.CostEstimate(
        flops=int(6 * Bp * C * HW + 4 * Bp * C * Cr),
        transcendentals=int(Bp * HW),
        bytes_accessed=int(2 * Bp * C * HW * itemsize + 4 * (wpack.size + bpack.size)),
    )

    # TODO(synk): for production-size C*HW (e.g. C=2048, HW=3136 ~ 25.7 MiB/image
    # in f32) a full-residency per-image block exceeds v7x's 64 MiB VMEM; tile
    # the spatial axis with a two-pass / online softmax in that regime.
    out = pl.pallas_call(
        _gcb_kernel,
        out_shape=jax.ShapeDtypeStruct((Bp, C, HW), x.dtype),
        grid=(nb,),
        in_specs=[
            pl.BlockSpec((Bt, C, HW), lambda i: (i, 0, 0)),          # x (Bt images)
            pl.BlockSpec((C, 2 * Cr + 2), lambda i: (0, 0)),         # packed weights
            pl.BlockSpec((1, 1 + Cr), lambda i: (0, 0)),             # packed biases
        ],
        out_specs=pl.BlockSpec((Bt, C, HW), lambda i: (i, 0, 0)),
        compiler_params=pltpu.CompilerParams(
            dimension_semantics=("parallel",),
            vmem_limit_bytes=vmem_limit,
        ),
        cost_estimate=cost,
    )(xf, wpack, bpack)

    return out[:B].reshape(B, C, H, W)


# ----------------------------------------------------------------------------
# Pure-JAX reference (mirrors the PyTorch module exactly)
# ----------------------------------------------------------------------------
def gcb_reference(x, params):
    B, C, H, W = x.shape
    HW = H * W
    xf = x.reshape(B, C, HW).astype(jnp.float32)
    w1 = params["conv1_w"].reshape(C).astype(jnp.float32)
    b1 = params["conv1_b"].astype(jnp.float32)[0]
    w2 = params["ca0_w"].reshape(-1, C).astype(jnp.float32)
    b2 = params["ca0_b"].astype(jnp.float32)
    w3 = params["ca2_w"].reshape(C, -1).astype(jnp.float32)
    b3 = params["ca2_b"].astype(jnp.float32)

    logits = jnp.einsum("bcs,c->bs", xf, w1) + b1
    p = jax.nn.softmax(logits, axis=-1)
    ctx = jnp.einsum("bcs,bs->bc", xf, p)
    hid = jax.nn.relu(ctx @ w2.T + b2)
    ca = hid @ w3.T + b3
    return (xf * ca[:, :, None]).reshape(B, C, H, W).astype(x.dtype)


# ----------------------------------------------------------------------------
if __name__ == "__main__":
    # reduction=16 in the module => channels must be >= 16; pick a small C=32.
    # B=6 exercises the batched (Bt=3, grid=(2,)) path.
    B, C, H, W = 6, 32, 16, 16
    reduction = 16
    Cr = C // reduction

    key = jax.random.PRNGKey(0)
    kx, k1, k2, k3, k4, k5, k6 = jax.random.split(key, 7)
    x = jax.random.normal(kx, (B, C, H, W), jnp.float32)
    params = {
        "conv1_w": 0.1 * jax.random.normal(k1, (1, C, 1, 1), jnp.float32),
        "conv1_b": 0.1 * jax.random.normal(k2, (1,), jnp.float32),
        "ca0_w":   0.1 * jax.random.normal(k3, (Cr, C, 1, 1), jnp.float32),
        "ca0_b":   0.1 * jax.random.normal(k4, (Cr,), jnp.float32),
        "ca2_w":   0.1 * jax.random.normal(k5, (C, Cr, 1, 1), jnp.float32),
        "ca2_b":   0.1 * jax.random.normal(k6, (C,), jnp.float32),
    }

    y = jax.block_until_ready(gcb_forward(x, params))
    y_ref = jax.block_until_ready(gcb_reference(x, params))

    assert y.shape == (B, C, H, W), y.shape
    assert bool(jnp.all(jnp.isfinite(y)))
    max_err = float(jnp.max(jnp.abs(y - y_ref)))
    assert max_err < 1e-4, max_err
    print("KERNEL_OK")
</pallas_src>

<mosaic_0001>
module attributes {stable_mosaic.version = 11 : i64} {
  func.func @_gcb_kernel(%arg0: i32, %arg1: memref<3x32x256xf32, #tpu.memory_space<vmem>>, %arg2: memref<32x6xf32, #tpu.memory_space<vmem>>, %arg3: memref<1x3xf32, #tpu.memory_space<vmem>>, %arg4: memref<3x32x256xf32, #tpu.memory_space<vmem>>) attributes {dimension_semantics = [#tpu.dimension_semantics<parallel>], iteration_bounds = array<i64: 2>, scalar_prefetch = 0 : i64, scratch_operands = 0 : i64, tpu.core_type = #tpu.core_type<tc>, window_params = [{transform_indices = @transform_0, window_bounds = array<i64: 3, 32, 256>}, {pipeline_mode = #tpu.pipeline_mode<synchronous>, transform_indices = @transform_1, window_bounds = array<i64: 32, 6>}, {pipeline_mode = #tpu.pipeline_mode<synchronous>, transform_indices = @transform_2, window_bounds = array<i64: 1, 3>}, {transform_indices = @transform_3, window_bounds = array<i64: 3, 32, 256>}]} {
    %c0 = arith.constant 0 : index
    %c0_0 = arith.constant 0 : index
    %c0_1 = arith.constant 0 : index
    %0 = vector.load %arg1[%c0, %c0_0, %c0_1] : memref<3x32x256xf32, #tpu.memory_space<vmem>>, vector<3x32x256xf32>
    %c0_2 = arith.constant 0 : index
    %c0_3 = arith.constant 0 : index
    %1 = vector.load %arg2[%c0_2, %c0_3] : memref<32x6xf32, #tpu.memory_space<vmem>>, vector<32x1xf32>
    %c0_4 = arith.constant 0 : index
    %c1 = arith.constant 1 : index
    %2 = vector.load %arg2[%c0_4, %c1] : memref<32x6xf32, #tpu.memory_space<vmem>>, vector<32x2xf32>
    %c0_5 = arith.constant 0 : index
    %c3 = arith.constant 3 : index
    %3 = vector.load %arg2[%c0_5, %c3] : memref<32x6xf32, #tpu.memory_space<vmem>>, vector<32x2xf32>
    %c0_6 = arith.constant 0 : index
    %c5 = arith.constant 5 : index
    %4 = vector.load %arg2[%c0_6, %c5] : memref<32x6xf32, #tpu.memory_space<vmem>>, vector<32x1xf32>
    %c0_7 = arith.constant 0 : index
    %c0_8 = arith.constant 0 : index
    %5 = vector.load %arg3[%c0_7, %c0_8] : memref<1x3xf32, #tpu.memory_space<vmem>>, vector<1x1xf32>
    %c0_9 = arith.constant 0 : index
    %c1_10 = arith.constant 1 : index
    %6 = vector.load %arg3[%c0_9, %c1_10] : memref<1x3xf32, #tpu.memory_space<vmem>>, vector<1x2xf32>
    %7 = vector.shape_cast %1 : vector<32x1xf32> to vector<1x32x1xf32>
    %8 = vector.broadcast %7 : vector<1x32x1xf32> to vector<3x32x256xf32>
    %9 = arith.mulf %0, %8 : vector<3x32x256xf32>
    %cst = arith.constant dense<0.000000e+00> : vector<3x256xf32>
    %10 = vector.multi_reduction <add>, %9, %cst [1] : vector<3x32x256xf32> to vector<3x256xf32>
    %11 = vector.shape_cast %10 : vector<3x256xf32> to vector<3x1x256xf32>
    %12 = vector.shape_cast %5 : vector<1x1xf32> to vector<1x1x1xf32>
    %13 = vector.broadcast %12 : vector<1x1x1xf32> to vector<3x1x256xf32>
    %14 = arith.addf %11, %13 : vector<3x1x256xf32>
    %cst_11 = arith.constant dense<0xFF800000> : vector<3x1xf32>
    %15 = vector.multi_reduction <maximumf>, %14, %cst_11 [2] : vector<3x1x256xf32> to vector<3x1xf32>
    %16 = vector.shape_cast %15 : vector<3x1xf32> to vector<3x1x1xf32>
    %17 = vector.broadcast %16 : vector<3x1x1xf32> to vector<3x1x256xf32>
    %18 = arith.subf %14, %17 : vector<3x1x256xf32>
    %19 = math.exp %18 : vector<3x1x256xf32>
    %cst_12 = arith.constant dense<0.000000e+00> : vector<3x1xf32>
    %20 = vector.multi_reduction <add>, %19, %cst_12 [2] : vector<3x1x256xf32> to vector<3x1xf32>
    %21 = vector.shape_cast %20 : vector<3x1xf32> to vector<3x1x1xf32>
    %22 = vector.broadcast %19 : vector<3x1x256xf32> to vector<3x32x256xf32>
    %23 = arith.mulf %0, %22 : vector<3x32x256xf32>
    %cst_13 = arith.constant dense<0.000000e+00> : vector<3x32xf32>
    %24 = vector.multi_reduction <add>, %23, %cst_13 [2] : vector<3x32x256xf32> to vector<3x32xf32>
    %25 = vector.shape_cast %24 : vector<3x32xf32> to vector<3x32x1xf32>
    %26 = vector.broadcast %21 : vector<3x1x1xf32> to vector<3x32x1xf32>
    %27 = arith.divf %25, %26 : vector<3x32x1xf32>
    %28 = vector.shape_cast %2 : vector<32x2xf32> to vector<1x32x2xf32>
    %29 = vector.broadcast %28 : vector<1x32x2xf32> to vector<3x32x2xf32>
    %30 = vector.broadcast %27 : vector<3x32x1xf32> to vector<3x32x2xf32>
    %31 = arith.mulf %29, %30 : vector<3x32x2xf32>
    %cst_14 = arith.constant dense<0.000000e+00> : vector<3x2xf32>
    %32 = vector.multi_reduction <add>, %31, %cst_14 [1] : vector<3x32x2xf32> to vector<3x2xf32>
    %33 = vector.shape_cast %32 : vector<3x2xf32> to vector<3x1x2xf32>
    %34 = vector.shape_cast %6 : vector<1x2xf32> to vector<1x1x2xf32>
    %35 = vector.broadcast %34 : vector<1x1x2xf32> to vector<3x1x2xf32>
    %36 = arith.addf %33, %35 : vector<3x1x2xf32>
    %cst_15 = arith.constant 0.000000e+00 : f32
    %37 = vector.broadcast %cst_15 : f32 to vector<3x1x2xf32>
    %38 = arith.maximumf %36, %37 : vector<3x1x2xf32>
    %39 = vector.shape_cast %3 : vector<32x2xf32> to vector<1x32x2xf32>
    %40 = vector.broadcast %39 : vector<1x32x2xf32> to vector<3x32x2xf32>
    %41 = vector.broadcast %38 : vector<3x1x2xf32> to vector<3x32x2xf32>
    %42 = arith.mulf %40, %41 : vector<3x32x2xf32>
    %cst_16 = arith.constant dense<0.000000e+00> : vector<3x32xf32>
    %43 = vector.multi_reduction <add>, %42, %cst_16 [2] : vector<3x32x2xf32> to vector<3x32xf32>
    %44 = vector.shape_cast %43 : vector<3x32xf32> to vector<3x32x1xf32>
    %45 = vector.shape_cast %4 : vector<32x1xf32> to vector<1x32x1xf32>
    %46 = vector.broadcast %45 : vector<1x32x1xf32> to vector<3x32x1xf32>
    %47 = arith.addf %44, %46 : vector<3x32x1xf32>
    %48 = vector.broadcast %47 : vector<3x32x1xf32> to vector<3x32x256xf32>
    %49 = arith.mulf %0, %48 : vector<3x32x256xf32>
    %c0_17 = arith.constant 0 : index
    %c0_18 = arith.constant 0 : index
    %c0_19 = arith.constant 0 : index
    %50 = vector.load %arg4[%c0_17, %c0_18, %c0_19] : memref<3x32x256xf32, #tpu.memory_space<vmem>>, vector<3x32x256xf32>
    tpu.vector_store %arg4[%c0_17, %c0_18, %c0_19], %49 {strides = array<i32>} : memref<3x32x256xf32, #tpu.memory_space<vmem>>, vector<3x32x256xf32>,
    return
  }
  func.func @transform_0(%arg0: i32) -> (i32, i32, i32) {
    %c0_i32 = arith.constant 0 : i32
    %c0_i32_0 = arith.constant 0 : i32
    %c0_i32_1 = arith.constant 0 : i32
    return %arg0, %c0_i32, %c0_i32_0 : i32, i32, i32
  }
  func.func @transform_1(%arg0: i32) -> (i32, i32) {
    %c0_i32 = arith.constant 0 : i32
    %c0_i32_0 = arith.constant 0 : i32
    %c0_i32_1 = arith.constant 0 : i32
    return %c0_i32, %c0_i32_0 : i32, i32
  }
  func.func @transform_2(%arg0: i32) -> (i32, i32) {
    %c0_i32 = arith.constant 0 : i32
    %c0_i32_0 = arith.constant 0 : i32
    %c0_i32_1 = arith.constant 0 : i32
    return %c0_i32, %c0_i32_0 : i32, i32
  }
  func.func @transform_3(%arg0: i32) -> (i32, i32, i32) {
    %c0_i32 = arith.constant 0 : i32
    %c0_i32_0 = arith.constant 0 : i32
    %c0_i32_1 = arith.constant 0 : i32
    return %arg0, %c0_i32, %c0_i32_0 : i32, i32, i32
  }
}

</mosaic_0001>

<bundles_post_ra>
// kernel: gcb_forward.1
= control target key start
LH: loop header
LB: loop body
LE: loop exit
PB: predicated region body
PF: predicated region fallthrough
CT: control target
= control target key end

     0   :  { %s868_s12 = smov 0   ;;  %s1163_s0 = inlined_call_operand.vmem [shape: f32[6,32,256], index: 0, kind: input, shape index: {}]   ;;  %s1164_s1 = inlined_call_operand.vmem [shape: f32[32,6], index: 1, kind: input, shape index: {}]   ;;  %s1165_s2 = inlined_call_operand.vmem [shape: f32[1,3], index: 2, kind: input, shape index: {}]   ;;  %s1166_s3 = inlined_call_operand.vmem [shape: f32[6,32,256], index: 3, kind: output, shape index: {}]  }
   0x1 LB: > { %s789_s13 = sadd.s32 4294967295, %s842_s12   ;;  %p793_p0 = scmp.ge.s32.totalorder %s842_s12, 1  ;;  %s842_s12 = sphi %s868_s12, %s13_s12  }
   0x2   : > { %p139_p1 = scmp.lt.s32.totalorder %s842_s12, 3 }
   0x4   : > { %p140_p2 = pnand %p793_p0, %p139_p1 }
   0x6   : > { %143 = sbr.rel (%p140_p2) target bundleno = 1068 (0x42c), region = 32 }
   0xd   : > { %v879_v0 = vld [vmem:[%s1164_s1 + $0x10] sm:$0xff]  ;;  %v884_v1 = vld [vmem:[%s1164_s1] sm:$0xff]  ;;  %v844_v2 = vmov 0   ;;  %v891_v3 = vld [vmem:[%s1164_s1 + $0x18] sm:$0xff]  ;;  %s165_s24 = smul.u32 3, %s789_s13  ;;  %vm444_vm0 = vcmask 23560  }
   0xe   : > { %1179 = vst [vmem:[#allocation2_spill] sm:$0xff] %v879_v0  ;;  %1180 = vst [vmem:[#allocation3_spill] sm:$0xff] %v884_v1  ;;  %815 = vset.pattern.permute.xlu1 %v844_v2  ;;  %814 = vset.pattern.permute.xlu0 %v844_v2  ;;  %v896_v4 = vld [vmem:[%s1164_s1 + $0x8] sm:$0xff]  ;;  %v903_v5 = vld [vmem:[%s1165_s2] sm:$0x1]  ;;  %s845_s29 = smov 2  }
   0xf   : > { %220 = vperm.xlu1 %815, %v879_v0   ;;  %210 = vperm.xlu0 %814, %v884_v1   ;;  %1181 = vst [vmem:[#allocation4_spill] sm:$0xff] %v891_v3  ;;  %1182 = vst [vmem:[#allocation5_spill] sm:$0xff] %v896_v4  ;;  %p166_p3 = scmp.lt.s32.totalorder %s165_s24, 5  ;;  %v311_v0 = vlaneseq  ;;  %s846_s30 = smov 125   ;;  %vm574_vm1 = vcmask 15360  }
  0x10   : > { %1183 = vst [vmem:[#allocation6_spill] sm:$0xff] %v903_v5 }
  0x11   : > { %s1192_s24 = smov (!%p166_p3, %s165_s24), 5 }
  0x12   : > { %s800_s25 = sshll.u32 %s1192_s24, 6 }
  0x13   : > { %225 = vperm.xlu1 %815, %v891_v3   ;;  %215 = vperm.xlu0 %814, %v896_v4   ;;  %s914_s28 = scalar_lea.vmem %s1163_s0, %s800_s25  ;;  %s1110_s6 = scalar_lea.vmem %s1166_s3, %s800_s25 }
  0x14   : > { %v917_v6 = vld [vmem:[%s914_s28 + $0x20] sm:$0xff]  ;;  %v920_v7 = vld [vmem:[%s914_s28 + $0x28] sm:$0xff]  ;;  %v953_v20 = vld [vmem:[%s914_s28 + $0x30] sm:$0xff] }
  0x15   : > { %v923_v8 = vld [vmem:[%s914_s28 + $0x60] sm:$0xff]  ;;  %v926_v9 = vld [vmem:[%s914_s28 + $0x68] sm:$0xff]  ;;  %v956_v21 = vld [vmem:[%s914_s28 + $0x38] sm:$0xff] }
  0x16   : > { %v929_v10 = vld [vmem:[%s914_s28 + $0xa0] sm:$0xff]  ;;  %v932_v12 = vld [vmem:[%s914_s28 + $0xa8] sm:$0xff]  ;;  %1184 = vst [vmem:[#allocation7_spill] sm:$0xff] %v956_v21  ;;  %v963_v26 = vld [vmem:[%s914_s28 + $0x10] sm:$0xff] }
  0x17   : > { %308 = vperm.xlu0 %814, %v903_v5   ;;  %v935_v14 = vld [vmem:[%s914_s28] sm:$0xff]  ;;  %v938_v15 = vld [vmem:[%s914_s28 + $0x8] sm:$0xff]  ;;  %v966_v27 = vld [vmem:[%s914_s28 + $0x18] sm:$0xff] }
  0x18   : > { %v941_v16 = vld [vmem:[%s914_s28 + $0x40] sm:$0xff]  ;;  %v944_v17 = vld [vmem:[%s914_s28 + $0x48] sm:$0xff]  ;;  %v969_v28 = vld [vmem:[%s914_s28 + $0x50] sm:$0xff] }
  0x19   : > { %v947_v18 = vld [vmem:[%s914_s28 + $0x80] sm:$0xff]  ;;  %v950_v19 = vld [vmem:[%s914_s28 + $0x88] sm:$0xff]  ;;  %v976_v35 = vld [vmem:[%s914_s28 + $0x58] sm:$0xff] }
  0x1a   : > { %v979_v36 = vld [vmem:[%s914_s28 + $0x90] sm:$0xff]  ;;  %v982_v37 = vld [vmem:[%s914_s28 + $0x98] sm:$0xff] }
  0x1b   : > { %v989_v42 = vld [vmem:[%s914_s28 + $0x70] sm:$0xff]  ;;  %v992_v43 = vld [vmem:[%s914_s28 + $0x78] sm:$0xff] }
  0x1c   : > { %v999_v48 = vld [vmem:[%s914_s28 + $0xb0] sm:$0xff]  ;;  %v1002_v49 = vld [vmem:[%s914_s28 + $0xb8] sm:$0xff] }
  0x8e   : > { %v221_v11 = vpop.permute.xlu1 %220  ;;  %v211_v13 = vpop.permute.xlu0 %210 }
  0x8f   : > { %v232_v22 = vmul.f32 %v221_v11, %v917_v6  ;;  %v233_v23 = vmul.f32 %v221_v11, %v920_v7  ;;  %v240_v24 = vmul.f32 %v221_v11, %v923_v8  ;;  %v241_v25 = vmul.f32 %v221_v11, %v926_v9 }
  0x90   : > { %v248_v29 = vmul.f32 %v221_v11, %v929_v10  ;;  %v249_v30 = vmul.f32 %v221_v11, %v932_v12  ;;  %v228_v31 = vmul.f32 %v211_v13, %v935_v14  ;;  %v229_v32 = vmul.f32 %v211_v13, %v938_v15 }
  0x91   : > { %v236_v38 = vmul.f32 %v211_v13, %v941_v16  ;;  %v237_v39 = vmul.f32 %v211_v13, %v944_v17  ;;  %v244_v40 = vmul.f32 %v211_v13, %v947_v18  ;;  %v245_v41 = vmul.f32 %v211_v13, %v950_v19 }
  0x92   : > { %v226_v33 = vpop.permute.xlu1 %225  ;;  %v216_v34 = vpop.permute.xlu0 %215 }
  0x93   : > { %v234_v44 = vmul.f32 %v226_v33, %v953_v20  ;;  %v235_v45 = vmul.f32 %v226_v33, %v956_v21  ;;  %v230_v46 = vmul.f32 %v216_v34, %v963_v26  ;;  %v231_v47 = vmul.f32 %v216_v34, %v966_v27 }
  0x94   : > { %v238_v50 = vmul.f32 %v216_v34, %v969_v28  ;;  %v239_v51 = vmul.f32 %v216_v34, %v976_v35  ;;  %v246_v52 = vmul.f32 %v216_v34, %v979_v36  ;;  %v247_v53 = vmul.f32 %v216_v34, %v982_v37 }
  0x95   : > { %v242_v54 = vmul.f32 %v226_v33, %v989_v42  ;;  %v243_v55 = vmul.f32 %v226_v33, %v992_v43  ;;  %v252_v56 = vadd.f32 %v230_v46, %v228_v31  ;;  %v261_v57 = vadd.f32 %v231_v47, %v229_v32 }
  0x96   : > { %v270_v58 = vadd.f32 %v238_v50, %v236_v38  ;;  %v279_v59 = vadd.f32 %v239_v51, %v237_v39  ;;  %v288_v60 = vadd.f32 %v246_v52, %v244_v40  ;;  %v297_v61 = vadd.f32 %v247_v53, %v245_v41 }
  0x97   : > { %v250_v62 = vmul.f32 %v226_v33, %v999_v48  ;;  %v251_v63 = vmul.f32 %v226_v33, %v1002_v49  ;;  %v253_v2 = vadd.f32 %v252_v56, %v232_v22  ;;  %v262_v11 = vadd.f32 %v261_v57, %v233_v23  ;;  %v309_v56 = vpop.permute.xlu0 %308 }
  0x98   : > { %v271_v13 = vadd.f32 %v270_v58, %v240_v24  ;;  %v280_v5 = vadd.f32 %v279_v59, %v241_v25  ;;  %v289_v3 = vadd.f32 %v288_v60, %v248_v29  ;;  %v298_v34 = vadd.f32 %v297_v61, %v249_v30 }
  0x99   : > { %v254_v4 = vadd.f32 %v253_v2, %v234_v44  ;;  %v263_v1 = vadd.f32 %v262_v11, %v235_v45  ;;  %v312_v33 = vshrl.u32 %v311_v0, 7 }
  0x9a   : > { %v272_v21 = vadd.f32 %v271_v13, %v242_v54  ;;  %v281_v31 = vadd.f32 %v280_v5, %v243_v55  ;;  %v290_v32 = vadd.f32 %v289_v3, %v250_v62  ;;  %v299_v38 = vadd.f32 %v298_v34, %v251_v63 }
  0x9b   : > { %v255_v39 = vrot.slane %v254_v4, 4  ;;  %v264_v40 = vrot.slane %v263_v1, 4  ;;  %v1012_v53 = vsub.s32 0, %v312_v33 }
  0x9c   : > { %v273_v41 = vrot.slane %v272_v21, 4  ;;  %v282_v46 = vrot.slane %v281_v31, 4  ;;  %v291_v47 = vrot.slane %v290_v32, 4  ;;  %v300_v50 = vrot.slane %v299_v38, 4 }
  0x9d   : > { %v256_v22 = vadd.f32 %v255_v39, %v254_v4  ;;  %v265_v23 = vadd.f32 %v264_v40, %v263_v1  ;;  %v314_v63 = vrot.slane %v309_v56, %v1012_v53 }
  0x9e   : > { %v274_v24 = vadd.f32 %v273_v41, %v272_v21  ;;  %v283_v25 = vadd.f32 %v282_v46, %v281_v31  ;;  %v292_v29 = vadd.f32 %v291_v47, %v290_v32  ;;  %v301_v30 = vadd.f32 %v300_v50, %v299_v38 }
  0x9f   : > { %v257_v51 = vrot.slane %v256_v22, 2  ;;  %v266_v44 = vrot.slane %v265_v23, 2 }
  0xa0   : > { %v275_v45 = vrot.slane %v274_v24, 2  ;;  %v284_v52 = vrot.slane %v283_v25, 2  ;;  %v293_v5 = vrot.slane %v292_v29, 2  ;;  %v302_v3 = vrot.slane %v301_v30, 2 }
  0xa1   : > { %v258_v54 = vadd.f32 %v257_v51, %v256_v22  ;;  %v267_v55 = vadd.f32 %v266_v44, %v265_v23 }
  0xa2   : > { %v276_v57 = vadd.f32 %v275_v45, %v274_v24  ;;  %v285_v58 = vadd.f32 %v284_v52, %v283_v25  ;;  %v294_v0 = vadd.f32 %v293_v5, %v292_v29  ;;  %v303_v4 = vadd.f32 %v302_v3, %v301_v30 }
  0xa3   : > { %v259_v1 = vrot.slane %v258_v54, 1  ;;  %v268_v21 = vrot.slane %v267_v55, 1 }
  0xa4   : > { %v277_v59 = vrot.slane %v276_v57, 1  ;;  %v286_v60 = vrot.slane %v285_v58, 1  ;;  %v295_v61 = vrot.slane %v294_v0, 1  ;;  %v304_v62 = vrot.slane %v303_v4, 1 }
  0xa5   : > { %v260_v2 = vadd.f32 %v259_v1, %v258_v54  ;;  %v269_v11 = vadd.f32 %v268_v21, %v267_v55 }
  0xa6   : > { %v278_v13 = vadd.f32 %v277_v59, %v276_v57  ;;  %v287_v34 = vadd.f32 %v286_v60, %v285_v58  ;;  %v296_v31 = vadd.f32 %v295_v61, %v294_v0  ;;  %v305_v32 = vadd.f32 %v304_v62, %v303_v4 }
  0xa7   : > { %v315_v38 = vadd.f32 %v314_v63, %v260_v2  ;;  %v316_v39 = vadd.f32 %v314_v63, %v269_v11 }
  0xa8   : > { %v317_v40 = vadd.f32 %v314_v63, %v278_v13  ;;  %v318_v41 = vadd.f32 %v314_v63, %v287_v34  ;;  %v319_v50 = vadd.f32 %v314_v63, %v296_v31  ;;  %v320_v33 = vadd.f32 %v314_v63, %v305_v32 }
  0xa9   : > { %v321_v46 = vmax.f32 %v315_v38, %v316_v39 }
  0xaa   : > { %v324_v47 = vmax.f32 %v317_v40, %v318_v41  ;;  %v327_v22 = vmax.f32 %v319_v50, %v320_v33 }
  0xab   : > { %322 = vmax.xlane.f32.xlu1 %v321_v46 }
  0xac   : > { %325 = vmax.xlane.f32.xlu0 %v324_v47 }
  0xb0   : > { %328 = vmax.xlane.f32.xlu0 %v327_v22 }
 0x138   : > { %v323_v23 = vpop.xlane.xlu1 %322 }
 0x139   : > { %v326_v24 = vpop.xlane.xlu0 %325  ;;  %v330_v25 = vsub.f32 %v315_v38, %v323_v23  ;;  %v331_v29 = vsub.f32 %v316_v39, %v323_v23 }
 0x13a   : > { %v332_v30 = vsub.f32 %v317_v40, %v326_v24  ;;  %v333_v51 = vsub.f32 %v318_v41, %v326_v24 }
 0x13b   : > { %v336_v44 = vmul.f32 1.442695, %v330_v25  ;;  %v338_v5 = vmul.f32 1.442695, %v331_v29 }
 0x13c   : > { %v340_v45 = vmul.f32 1.442695, %v332_v30  ;;  %v342_v52 = vmul.f32 1.442695, %v333_v51 }
 0x13d   : > { %818 = vpow2.f32 %v336_v44  ;;  %v329_v3 = vpop.xlane.xlu0 %328 }
 0x13e   : > { %820 = vpow2.f32 %v340_v45  ;;  %v334_v54 = vsub.f32 %v319_v50, %v329_v3  ;;  %v335_v55 = vsub.f32 %v320_v33, %v329_v3 }
 0x13f   : > { %822 = vpow2.f32 %v342_v52 }
 0x140   : > { %824 = vpow2.f32 %v338_v5  ;;  %v344_v56 = vmul.f32 1.442695, %v334_v54  ;;  %v346_v57 = vmul.f32 1.442695, %v335_v55 }
 0x142   : > { %826 = vpow2.f32 %v344_v56 }
 0x143   : > { %828 = vpow2.f32 %v346_v57  ;;  %v1185_v57 = vld [vmem:[#allocation7_spill] sm:$0xff] }
 0x147   : > { %v819_v58 = vpop.eup %818 }
 0x148   : > { %v821_v0 = vpop.eup %820  ;;  %v357_v59 = vmul.f32 %v819_v58, %v935_v14  ;;  %v359_v31 = vmul.f32 %v819_v58, %v963_v26  ;;  %v361_v33 = vmul.f32 %v819_v58, %v917_v6  ;;  %v363_v56 = vmul.f32 %v819_v58, %v953_v20 }
 0x149   : > { %v823_v4 = vpop.eup %822  ;;  %v365_v13 = vmul.f32 %v821_v0, %v941_v16  ;;  %v367_v46 = vmul.f32 %v821_v0, %v969_v28  ;;  %v369_v45 = vmul.f32 %v821_v0, %v923_v8  ;;  %v371_v3 = vmul.f32 %v821_v0, %v989_v42 }
 0x14a   : > { %v825_v1 = vpop.eup %824  ;;  %v351_v21 = vadd.f32 %v823_v4, %v821_v0  ;;  %v366_v34 = vmul.f32 %v823_v4, %v944_v17  ;;  %v368_v47 = vmul.f32 %v823_v4, %v976_v35  ;;  %v370_v52 = vmul.f32 %v823_v4, %v926_v9 }
 0x14b   : > { %v348_v60 = vadd.f32 %v825_v1, %v819_v58  ;;  %v358_v61 = vmul.f32 %v825_v1, %v938_v15  ;;  %v360_v32 = vmul.f32 %v825_v1, %v966_v27  ;;  %v362_v22 = vmul.f32 %v825_v1, %v920_v7 }
 0x14c   : > { %v827_v62 = vpop.eup %826  ;;  %352 = vadd.xlane.f32.xlu0 %v351_v21  ;;  %v393_v38 = vadd.f32 %v366_v34, %v365_v13  ;;  %v396_v23 = vadd.f32 %v368_v47, %v367_v46  ;;  %v372_v54 = vmul.f32 %v823_v4, %v992_v43  ;;  %v399_v55 = vadd.f32 %v370_v52, %v369_v45 }
 0x14d   : > { %v829_v63 = vpop.eup %828  ;;  %349 = vadd.xlane.f32.xlu1 %v348_v60  ;;  %v381_v2 = vadd.f32 %v358_v61, %v357_v59  ;;  %v373_v39 = vmul.f32 %v827_v62, %v947_v18  ;;  %v384_v41 = vadd.f32 %v360_v32, %v359_v31  ;;  %v375_v24 = vmul.f32 %v827_v62, %v979_v36 }
 0x14e   : > { %v354_v11 = vadd.f32 %v829_v63, %v827_v62  ;;  %v374_v40 = vmul.f32 %v829_v63, %v950_v19  ;;  %v376_v25 = vmul.f32 %v829_v63, %v982_v37  ;;  %v387_v29 = vadd.f32 %v362_v22, %v361_v33 }
 0x14f   : > { %v377_v30 = vmul.f32 %v827_v62, %v929_v10  ;;  %v378_v51 = vmul.f32 %v829_v63, %v932_v12  ;;  %v364_v21 = vmul.f32 %v825_v1, %v1185_v57  ;;  %v402_v59 = vadd.f32 %v372_v54, %v371_v3  ;;  %v1188_v54 = vld [vmem:[#allocation2_spill] sm:$0xff] }
 0x150   : > { %382 = vadd.xlane.f32.xlu0 %v381_v2  ;;  %v405_v50 = vadd.f32 %v374_v40, %v373_v39  ;;  %v408_v44 = vadd.f32 %v376_v25, %v375_v24  ;;  %v379_v61 = vmul.f32 %v827_v62, %v999_v48  ;;  %v380_v2 = vmul.f32 %v829_v63, %v1002_v49 }
 0x151   : > { %355 = vadd.xlane.f32.xlu1 %v354_v11  ;;  %v411_v5 = vadd.f32 %v378_v51, %v377_v30  ;;  %v390_v60 = vadd.f32 %v364_v21, %v363_v56 }
 0x152   : > { %v414_v11 = vadd.f32 %v380_v2, %v379_v61 }
 0x154   : > { %394 = vadd.xlane.f32.xlu0 %v393_v38 }
 0x155   : > { %385 = vadd.xlane.f32.xlu1 %v384_v41 }
 0x158   : > { %406 = vadd.xlane.f32.xlu0 %v405_v50  ;;  %v1186_v50 = vld [vmem:[#allocation3_spill] sm:$0xff] }
 0x159   : > { %397 = vadd.xlane.f32.xlu1 %v396_v23  ;;  %v1187_v23 = vld [vmem:[#allocation5_spill] sm:$0xff] }
 0x15c   : > { %388 = vadd.xlane.f32.xlu0 %v387_v29 }
 0x15d   : > { %409 = vadd.xlane.f32.xlu1 %v408_v44 }
 0x160   : > { %412 = vadd.xlane.f32.xlu0 %v411_v5 }
 0x161   : > { %400 = vadd.xlane.f32.xlu1 %v399_v55 }
 0x164   : > { %403 = vadd.xlane.f32.xlu0 %v402_v59 }
 0x165   : > { %391 = vadd.xlane.f32.xlu1 %v390_v60 }
 0x169   : > { %415 = vadd.xlane.f32.xlu1 %v414_v11 }
 0x1d9   : > { %v353_v0 = vpop.xlane.xlu0 %352 }
 0x1da   : > { %830 = vrcp.f32 %v353_v0  ;;  %v350_v4 = vpop.xlane.xlu1 %349 }
 0x1db   : > { %832 = vrcp.f32 %v350_v4 }
 0x1dd   : > { %v383_v13 = vpop.xlane.xlu0 %382 }
 0x1de   : > { %v356_v58 = vpop.xlane.xlu1 %355 }
 0x1df   : > { %834 = vrcp.f32 %v356_v58 }
 0x1e1   : > { %v395_v1 = vpop.xlane.xlu0 %394 }
 0x1e2   : > { %v386_v34 = vpop.xlane.xlu1 %385 }
 0x1e4   : > { %v831_v31 = vpop.eup %830 }
 0x1e5   : > { %v833_v32 = vpop.eup %832  ;;  %v407_v38 = vpop.xlane.xlu0 %406  ;;  %v423_v39 = vmul.f32 %v831_v31, %v395_v1 }
 0x1e6   : > { %v398_v62 = vpop.xlane.xlu1 %397  ;;  %v418_v63 = vmul.f32 %v833_v32, %v383_v13  ;;  %v419_v41 = vmul.f32 %v833_v32, %v386_v34 }
 0x1e7   : > { %v424_v40 = vmul.f32 %v831_v31, %v398_v62  ;;  %v436_v33 = vmul.f32 %v423_v39, %v1186_v50 }
 0x1e8   : > { %v432_v29 = vmul.f32 %v418_v63, %v1186_v50  ;;  %v433_v30 = vmul.f32 %v419_v41, %v1187_v23 }
 0x1e9   : > { %v389_v46 = vpop.xlane.xlu0 %388  ;;  %v835_v47 = vpop.eup %834  ;;  %v437_v24 = vmul.f32 %v424_v40, %v1187_v23  ;;  %v458_v52 = vsel %vm444_vm0, %v436_v33, 0.0  ;;  %v1189_v40 = vld [vmem:[#allocation4_spill] sm:$0xff] }
 0x1ea   : > { %v410_v22 = vpop.xlane.xlu1 %409  ;;  %v420_v25 = vmul.f32 %v833_v32, %v389_v46  ;;  %v428_v51 = vmul.f32 %v835_v47, %v407_v38  ;;  %v445_v59 = vsel %vm444_vm0, %v432_v29, 0.0  ;;  %v446_v60 = vsel %vm444_vm0, %v433_v30, 0.0 }
 0x1eb   : > { %v429_v44 = vmul.f32 %v835_v47, %v410_v22  ;;  %v459_v3 = vsel %vm444_vm0, %v437_v24, 0.0  ;;  %v447_v62 = vadd.f32 %v446_v60, %v445_v59 }
 0x1ec   : > { %v434_v55 = vmul.f32 %v420_v25, %v1188_v54  ;;  %v440_v61 = vmul.f32 %v428_v51, %v1186_v50  ;;  %v460_v4 = vadd.f32 %v459_v3, %v458_v52 }
 0x1ed   : > { %v413_v45 = vpop.xlane.xlu0 %412  ;;  %v441_v2 = vmul.f32 %v429_v44, %v1187_v23 }
 0x1ee   : > { %v401_v5 = vpop.xlane.xlu1 %400  ;;  %v430_v56 = vmul.f32 %v835_v47, %v413_v45  ;;  %v448_v1 = vsel %vm444_vm0, %v434_v55, 0.0  ;;  %v471_v41 = vsel %vm444_vm0, %v440_v61, 0.0 }
 0x1ef   : > { %v425_v21 = vmul.f32 %v831_v31, %v401_v5  ;;  %v472_v46 = vsel %vm444_vm0, %v441_v2, 0.0  ;;  %v449_v24 = vadd.f32 %v448_v1, %v447_v62  ;;  %v1190_v62 = vld [vmem:[#allocation6_spill] sm:$0xff] }
 0x1f0   : > { %v442_v34 = vmul.f32 %v430_v56, %v1188_v54  ;;  %v473_v44 = vadd.f32 %v472_v46, %v471_v41 }
 0x1f1   : > { %v438_v11 = vmul.f32 %v425_v21, %v1188_v54  ;;  %v404_v0 = vpop.xlane.xlu0 %403 }
 0x1f2   : > { %v426_v13 = vmul.f32 %v831_v31, %v404_v0  ;;  %v392_v58 = vpop.xlane.xlu1 %391  ;;  %v474_v29 = vsel %vm444_vm0, %v442_v34, 0.0 }
 0x1f3   : > { %v461_v38 = vsel %vm444_vm0, %v438_v11, 0.0  ;;  %v421_v39 = vmul.f32 %v833_v32, %v392_v58  ;;  %v475_v3 = vadd.f32 %v474_v29, %v473_v44 }
 0x1f4   : > { %v439_v63 = vmul.f32 %v426_v13, %v1189_v40  ;;  %v462_v33 = vadd.f32 %v461_v38, %v460_v4 }
 0x1f5   : > { %v435_v22 = vmul.f32 %v421_v39, %v1189_v40 }
 0x1f6   : > { %v463_v31 = vsel %vm444_vm0, %v439_v63, 0.0  ;;  %v416_v25 = vpop.xlane.xlu1 %415 }
 0x1f7   : > { %v464_v30 = vadd.f32 %v463_v31, %v462_v33  ;;  %v450_v51 = vsel %vm444_vm0, %v435_v22, 0.0  ;;  %v431_v32 = vmul.f32 %v835_v47, %v416_v25 }
 0x1f8   : > { %v451_v45 = vadd.f32 %v450_v51, %v449_v24 }
 0x1f9   : > { %v465_v52 = vrot.slane %v464_v30, 4  ;;  %v443_v5 = vmul.f32 %v431_v32, %v1189_v40 }
 0x1fa   : > { %v452_v55 = vrot.slane %v451_v45, 4 }
 0x1fb   : > { %v466_v56 = vadd.f32 %v465_v52, %v464_v30  ;;  %v476_v21 = vsel %vm444_vm0, %v443_v5, 0.0 }
 0x1fc   : > { %v453_v59 = vadd.f32 %v452_v55, %v451_v45  ;;  %v477_v60 = vadd.f32 %v476_v21, %v475_v3 }
 0x1fd   : > { %v467_v61 = vrot.slane %v466_v56, 2 }
 0x1fe   : > { %v454_v2 = vrot.slane %v453_v59, 2  ;;  %v478_v11 = vrot.slane %v477_v60, 4 }
 0x1ff   : > { %v468_v0 = vadd.f32 %v467_v61, %v466_v56 }
 0x200   : > { %v455_v4 = vadd.f32 %v454_v2, %v453_v59  ;;  %v479_v13 = vadd.f32 %v478_v11, %v477_v60 }
 0x201   : > { %v469_v58 = vrot.slane %v468_v0, 1 }
 0x202   : > { %v480_v47 = vrot.slane %v479_v13, 2  ;;  %v456_v1 = vrot.slane %v455_v4, 1 }
 0x203   : > { %v470_v34 = vadd.f32 %v469_v58, %v468_v0 }
 0x204   : > { %v481_v38 = vadd.f32 %v480_v47, %v479_v13  ;;  %v457_v39 = vadd.f32 %v456_v1, %v455_v4 }
 0x205   : > { %v485_v63 = vadd.f32 %v470_v34, %v1190_v62 }
 0x206   : > { %v484_v41 = vadd.f32 %v457_v39, %v1190_v62  ;;  %v482_v46 = vrot.slane %v481_v38, 1 }
 0x207   : > { %v488_v33 = vmax.f32 %v485_v63, 0.0 }
 0x208   : > { %v487_v22 = vmax.f32 %v484_v41, 0.0  ;;  %v483_v24 = vadd.f32 %v482_v46, %v481_v38 }
 0x209   : > { %v497_v31 = vrot.slane %v488_v33, %v1012_v53 }
 0x20a   : > { %v493_v25 = vrot.slane %v487_v22, %v1012_v53  ;;  %v486_v29 = vadd.f32 %v483_v24, %v1190_v62 }
 0x20b   : > { %507 = vrot.lane.b32.xlu1 %v497_v31, %s845_s29 }
 0x20c   : > { %505 = vrot.lane.b32.xlu0 %v493_v25, %s845_s29  ;;  %v489_v30 = vmax.f32 %v486_v29, 0.0 }
 0x20e   : > { %v501_v51 = vrot.slane %v489_v30, %v1012_v53  ;;  %v847_v30 = vmov 5  }
 0x20f   : > { %816 = vset.pattern.permute.xlu1 %v847_v30  ;;  %817 = vset.pattern.permute.xlu0 %v847_v30 }
 0x210   : > { %509 = vrot.lane.b32.xlu1 %v501_v51, %s845_s29 }
 0x27d   : > { %v508_v3 = vpop.permute.xlu1 %507 }
 0x27e   : > { %v506_v32 = vpop.permute.xlu0 %505  ;;  %v519_v55 = vmul.f32 %v508_v3, %v1187_v23  ;;  %v518_v53 = vmul.f32 %v508_v3, %v1186_v50  ;;  %v521_v56 = vmul.f32 %v508_v3, %v1189_v40  ;;  %v520_v21 = vmul.f32 %v508_v3, %v1188_v54 }
 0x27f   : > { %v514_v44 = vmul.f32 %v506_v32, %v1186_v50  ;;  %v515_v45 = vmul.f32 %v506_v32, %v1187_v23  ;;  %v516_v52 = vmul.f32 %v506_v32, %v1188_v54  ;;  %v517_v5 = vmul.f32 %v506_v32, %v1189_v40 }
 0x281   : > { %538 = vrot.lane.b32.xlu0 %v514_v44, %s846_s30  ;;  %540 = vrot.lane.b32.xlu1 %v515_v45, %s846_s30 }
 0x282   : > { %v510_v59 = vpop.permute.xlu1 %509 }
 0x283   : > { %v523_v60 = vmul.f32 %v510_v59, %v1187_v23  ;;  %v522_v61 = vmul.f32 %v510_v59, %v1186_v50  ;;  %v525_v2 = vmul.f32 %v510_v59, %v1189_v40  ;;  %v524_v11 = vmul.f32 %v510_v59, %v1188_v54 }
 0x285   : > { %542 = vrot.lane.b32.xlu0 %v516_v52, %s846_s30  ;;  %544 = vrot.lane.b32.xlu1 %v517_v5, %s846_s30 }
 0x289   : > { %548 = vrot.lane.b32.xlu1 %v519_v55, %s846_s30  ;;  %546 = vrot.lane.b32.xlu0 %v518_v53, %s846_s30 }
 0x28d   : > { %552 = vrot.lane.b32.xlu1 %v521_v56, %s846_s30  ;;  %550 = vrot.lane.b32.xlu0 %v520_v21, %s846_s30 }
 0x291   : > { %556 = vrot.lane.b32.xlu1 %v523_v60, %s846_s30  ;;  %554 = vrot.lane.b32.xlu0 %v522_v61, %s846_s30 }
 0x295   : > { %560 = vrot.lane.b32.xlu1 %v525_v2, %s846_s30  ;;  %558 = vrot.lane.b32.xlu0 %v524_v11, %s846_s30 }
 0x2f3   : > { %v539_v0 = vpop.permute.xlu0 %538  ;;  %v541_v4 = vpop.permute.xlu1 %540 }
 0x2f4   : > { %v575_v13 = vsel %vm574_vm1, %v539_v0, 0.0  ;;  %v578_v58 = vsel %vm574_vm1, %v541_v4, 0.0 }
 0x2f5   : > { %576 = vadd.xlane.f32.xlu0 %v575_v13  ;;  %579 = vadd.xlane.f32.xlu1 %v578_v58 }
 0x2f7   : > { %v543_v47 = vpop.permute.xlu0 %542  ;;  %v545_v1 = vpop.permute.xlu1 %544 }
 0x2f8   : > { %v581_v34 = vsel %vm574_vm1, %v543_v47, 0.0  ;;  %v584_v63 = vsel %vm574_vm1, %v545_v1, 0.0 }
 0x2f9   : > { %582 = vadd.xlane.f32.xlu0 %v581_v34 }
 0x2fb   : > { %v547_v38 = vpop.permute.xlu0 %546  ;;  %v549_v39 = vpop.permute.xlu1 %548 }
 0x2fc   : > { %v587_v62 = vsel %vm574_vm1, %v547_v38, 0.0  ;;  %v590_v22 = vsel %vm574_vm1, %v549_v39, 0.0 }
 0x2fd   : > { %588 = vadd.xlane.f32.xlu1 %v587_v62  ;;  %585 = vadd.xlane.f32.xlu0 %v584_v63 }
 0x2ff   : > { %v551_v41 = vpop.permute.xlu0 %550  ;;  %v553_v46 = vpop.permute.xlu1 %552 }
 0x300   : > { %v593_v33 = vsel %vm574_vm1, %v551_v41, 0.0  ;;  %v596_v29 = vsel %vm574_vm1, %v553_v46, 0.0 }
 0x301   : > { %594 = vadd.xlane.f32.xlu1 %v593_v33  ;;  %591 = vadd.xlane.f32.xlu0 %v590_v22 }
 0x303   : > { %v555_v24 = vpop.permute.xlu0 %554  ;;  %v557_v31 = vpop.permute.xlu1 %556 }
 0x304   : > { %v599_v25 = vsel %vm574_vm1, %v555_v24, 0.0  ;;  %v602_v44 = vsel %vm574_vm1, %v557_v31, 0.0 }
 0x305   : > { %600 = vadd.xlane.f32.xlu1 %v599_v25  ;;  %597 = vadd.xlane.f32.xlu0 %v596_v29 }
 0x307   : > { %v559_v51 = vpop.permute.xlu0 %558  ;;  %v561_v45 = vpop.permute.xlu1 %560 }
 0x308   : > { %v605_v32 = vsel %vm574_vm1, %v559_v51, 0.0  ;;  %v608_v52 = vsel %vm574_vm1, %v561_v45, 0.0 }
 0x309   : > { %606 = vadd.xlane.f32.xlu1 %v605_v32  ;;  %603 = vadd.xlane.f32.xlu0 %v602_v44 }
 0x30d   : > { %609 = vadd.xlane.f32.xlu0 %v608_v52 }
 0x382   : > { %v577_v5 = vpop.xlane.xlu0 %576  ;;  %v580_v3 = vpop.xlane.xlu1 %579 }
 0x383   : > { %v611_v55 = vadd.f32 %v577_v5, %v1186_v50  ;;  %v612_v53 = vadd.f32 %v580_v3, %v1187_v23 }
 0x385   : > { %625 = vperm.xlu1 %816, %v611_v55   ;;  %630 = vperm.xlu0 %817, %v612_v53  }
 0x386   : > { %v583_v56 = vpop.xlane.xlu0 %582 }
 0x387   : > { %v613_v21 = vadd.f32 %v583_v56, %v1188_v54 }
 0x389   : > { %635 = vperm.xlu1 %816, %v613_v21  }
 0x38a   : > { %v586_v59 = vpop.xlane.xlu0 %585  ;;  %v589_v60 = vpop.xlane.xlu1 %588 }
 0x38b   : > { %v614_v61 = vadd.f32 %v586_v59, %v1189_v40  ;;  %v615_v11 = vadd.f32 %v589_v60, %v1186_v50 }
 0x38d   : > { %640 = vperm.xlu1 %816, %v614_v61  }
 0x38e   : > { %v595_v2 = vpop.xlane.xlu1 %594  ;;  %v592_v0 = vpop.xlane.xlu0 %591 }
 0x38f   : > { %v616_v13 = vadd.f32 %v592_v0, %v1187_v23  ;;  %v617_v47 = vadd.f32 %v595_v2, %v1188_v54 }
 0x391   : > { %645 = vperm.xlu1 %816, %v615_v11  }
 0x392   : > { %v601_v4 = vpop.xlane.xlu1 %600  ;;  %v598_v34 = vpop.xlane.xlu0 %597 }
 0x393   : > { %v618_v38 = vadd.f32 %v598_v34, %v1189_v40  ;;  %v619_v62 = vadd.f32 %v601_v4, %v1186_v50 }
 0x395   : > { %650 = vperm.xlu1 %816, %v616_v13  }
 0x396   : > { %v607_v58 = vpop.xlane.xlu1 %606  ;;  %v604_v39 = vpop.xlane.xlu0 %603 }
 0x397   : > { %v621_v1 = vadd.f32 %v607_v58, %v1188_v54  ;;  %v620_v63 = vadd.f32 %v604_v39, %v1187_v23 }
 0x399   : > { %655 = vperm.xlu1 %816, %v617_v47   ;;  %675 = vperm.xlu0 %817, %v621_v1  }
 0x39a   : > { %v610_v41 = vpop.xlane.xlu0 %609 }
 0x39b   : > { %v622_v46 = vadd.f32 %v610_v41, %v1189_v40 }
 0x39d   : > { %660 = vperm.xlu1 %816, %v618_v38  }
 0x3a1   : > { %665 = vperm.xlu1 %816, %v619_v62  }
 0x3a5   : > { %670 = vperm.xlu1 %816, %v620_v63  }
 0x3a9   : > { %680 = vperm.xlu1 %816, %v622_v46  }
 0x404   : > { %v631_v50 = vpop.permute.xlu0 %630  ;;  %v626_v54 = vpop.permute.xlu1 %625 }
 0x405   : > { %v685_v23 = vmul.f32 %v631_v50, %v963_v26  ;;  %v686_v40 = vmul.f32 %v631_v50, %v966_v27  ;;  %v683_v33 = vmul.f32 %v626_v54, %v935_v14  ;;  %v684_v22 = vmul.f32 %v626_v54, %v938_v15 }
 0x407   : > { %709 = vst [vmem:[%s1110_s6 + $0x10] sm:$0xff] %v685_v23  ;;  %710 = vst [vmem:[%s1110_s6 + $0x18] sm:$0xff] %v686_v40 }
 0x408   : > { %707 = vst [vmem:[%s1110_s6] sm:$0xff] %v683_v33  ;;  %708 = vst [vmem:[%s1110_s6 + $0x8] sm:$0xff] %v684_v22  ;;  %v636_v24 = vpop.permute.xlu1 %635 }
 0x409   : > { %v687_v31 = vmul.f32 %v636_v24, %v917_v6  ;;  %v688_v25 = vmul.f32 %v636_v24, %v920_v7 }
 0x40b   : > { %711 = vst [vmem:[%s1110_s6 + $0x20] sm:$0xff] %v687_v31  ;;  %712 = vst [vmem:[%s1110_s6 + $0x28] sm:$0xff] %v688_v25 }
 0x40c   : > { %v641_v26 = vpop.permute.xlu1 %640 }
 0x40d   : > { %v689_v14 = vmul.f32 %v641_v26, %v953_v20  ;;  %v690_v15 = vmul.f32 %v641_v26, %v1185_v57 }
 0x40f   : > { %713 = vst [vmem:[%s1110_s6 + $0x30] sm:$0xff] %v689_v14  ;;  %714 = vst [vmem:[%s1110_s6 + $0x38] sm:$0xff] %v690_v15 }
 0x410   : > { %v646_v27 = vpop.permute.xlu1 %645 }
 0x411   : > { %v691_v29 = vmul.f32 %v646_v27, %v941_v16  ;;  %v692_v6 = vmul.f32 %v646_v27, %v944_v17 }
 0x413   : > { %715 = vst [vmem:[%s1110_s6 + $0x40] sm:$0xff] %v691_v29  ;;  %716 = vst [vmem:[%s1110_s6 + $0x48] sm:$0xff] %v692_v6 }
 0x414   : > { %v651_v7 = vpop.permute.xlu1 %650 }
 0x415   : > { %v693_v30 = vmul.f32 %v651_v7, %v969_v28  ;;  %v694_v20 = vmul.f32 %v651_v7, %v976_v35 }
 0x417   : > { %717 = vst [vmem:[%s1110_s6 + $0x50] sm:$0xff] %v693_v30  ;;  %718 = vst [vmem:[%s1110_s6 + $0x58] sm:$0xff] %v694_v20 }
 0x418   : > { %v676_v57 = vpop.permute.xlu0 %675  ;;  %v656_v51 = vpop.permute.xlu1 %655 }
 0x419   : > { %v703_v16 = vmul.f32 %v676_v57, %v929_v10  ;;  %v704_v17 = vmul.f32 %v676_v57, %v932_v12  ;;  %v695_v32 = vmul.f32 %v656_v51, %v923_v8  ;;  %v696_v44 = vmul.f32 %v656_v51, %v926_v9 }
 0x41b   : > { %727 = vst [vmem:[%s1110_s6 + $0xa0] sm:$0xff] %v703_v16  ;;  %728 = vst [vmem:[%s1110_s6 + $0xa8] sm:$0xff] %v704_v17 }
 0x41c   : > { %719 = vst [vmem:[%s1110_s6 + $0x60] sm:$0xff] %v695_v32  ;;  %720 = vst [vmem:[%s1110_s6 + $0x68] sm:$0xff] %v696_v44  ;;  %v661_v28 = vpop.permute.xlu1 %660 }
 0x41d   : > { %v697_v35 = vmul.f32 %v661_v28, %v989_v42  ;;  %v698_v45 = vmul.f32 %v661_v28, %v992_v43 }
 0x41f   : > { %721 = vst [vmem:[%s1110_s6 + $0x70] sm:$0xff] %v697_v35  ;;  %722 = vst [vmem:[%s1110_s6 + $0x78] sm:$0xff] %v698_v45 }
 0x420   : > { %v666_v10 = vpop.permute.xlu1 %665 }
 0x421   : > { %v699_v8 = vmul.f32 %v666_v10, %v947_v18  ;;  %v700_v9 = vmul.f32 %v666_v10, %v950_v19 }
 0x423   : > { %723 = vst [vmem:[%s1110_s6 + $0x80] sm:$0xff] %v699_v8  ;;  %724 = vst [vmem:[%s1110_s6 + $0x88] sm:$0xff] %v700_v9 }
 0x424   : > { %v671_v12 = vpop.permute.xlu1 %670 }
 0x425   : > { %v701_v52 = vmul.f32 %v671_v12, %v979_v36  ;;  %v702_v5 = vmul.f32 %v671_v12, %v982_v37 }
 0x427   : > { %725 = vst [vmem:[%s1110_s6 + $0x90] sm:$0xff] %v701_v52  ;;  %726 = vst [vmem:[%s1110_s6 + $0x98] sm:$0xff] %v702_v5 }
 0x428   : > { %v681_v42 = vpop.permute.xlu1 %680 }
 0x429   : > { %v705_v43 = vmul.f32 %v681_v42, %v999_v48  ;;  %v706_v3 = vmul.f32 %v681_v42, %v1002_v49 }
 0x42b   : > { %729 = vst [vmem:[%s1110_s6 + $0xb0] sm:$0xff] %v705_v43  ;;  %730 = vst [vmem:[%s1110_s6 + $0xb8] sm:$0xff] %v706_v3 }
 0x42c PF: > { %s13_s12 = sadd.s32 1, %s842_s12  }
 0x42d   : > { %p10_p4 = scmp.ge.s32.totalorder %s13_s12, 4  }
 0x42f   :  { %12 = sbr.rel (!%p10_p4) target bundleno = 1 (0x1), region = 62 }

</bundles_post_ra>
